<compile_context>
chip_gen: v6e
topology: v6e:2x2x1
jax: 0.10.0
libtpu: 0.0.40
codegen_flags: <defaults>
</compile_context>

<pallas_src>
import jax
import jax.numpy as jnp
from jax.experimental import pallas as pl
from jax.experimental.pallas import tpu as pltpu


# --------------------------------------------------------------------------------------
# tiling / budget helpers
# --------------------------------------------------------------------------------------
def _choose_tiling(B: int):
    """Return (NC, TB, B_pad): #core-partials, batch tile, padded batch (multiple of NC*TB)."""
    if B >= 4096:
        nc, tb = 2, 1024          # big tiles amortize the ~0.35us/step overhead (review)
    elif B >= 1024:
        nc, tb = 2, 512
    elif B >= 256:
        nc, tb = 2, 128
    elif B >= 64:
        nc, tb = 1, 64
    else:
        nc, tb = 1, max(8, -(-B // 8) * 8)   # keep sublane (8) alignment
    b_pad = -(-B // (nc * tb)) * (nc * tb)
    return nc, tb, b_pad


def _vmem_budget_bytes(TB, C, Zd, H, HC, y_itemsize):
    """Right-sized VMEM budget: 2x-buffered inputs + resident weights + value temps, +50%."""
    lanes = lambda n: -(-n // 128) * 128
    dbl_inputs = 2 * TB * (lanes(C) * y_itemsize + lanes(Zd) * 2 + lanes(H + 2) * 4)
    resident = 2 * (Zd * lanes(HC) * 2 + 3 * lanes(HC) * 4
                    + HC * lanes(H) * 4 + H * lanes(HC) * 4)
    temps = 8 * TB * lanes(HC) * 4            # live (TB, HC) f32 values (logits/exp/masks)
    out_bufs = 2 * 8 * 128 * 4
    need = dbl_inputs + resident + temps + out_bufs
    return int(min(max(int(need * 1.5), 16 * 1024 * 1024), 64 * 1024 * 1024))


# --------------------------------------------------------------------------------------
# kernel
# --------------------------------------------------------------------------------------
def make_dib_kernel(n_heads: int, n_classes: int, batch_true: int, beta: float):
    """Build the DIB-loss kernel (H / C / true-B / beta baked in as static constants)."""
    H, C, Bt, beta = int(n_heads), int(n_classes), int(batch_true), float(beta)

    def dib_kernel(y_pred_ref, labs_ref, z_ref, w_z_ref, w_y_ref, b_ref,
                   colcls_ref, sel_ref, expand_ref, out_ref, acc_suff, acc_min):
        i = pl.program_id(1)          # batch-accumulation axis ("arbitrary", per core)

        @pl.when(i == 0)
        def _init():
            acc_suff[...] = jnp.zeros_like(acc_suff)
            acc_min[...] = jnp.zeros_like(acc_min)

        labs = labs_ref[...]                               # (TB, H+2) f32
        lab = labs[:, 0:1]                                 # true label (small int, exact in f32)
        valid = labs[:, 1:2]                               # 1.0 real row / 0.0 padded row
        nlab = labs[:, 2:2 + H]                            # (TB, H) nuisance labels
        col_cls = colcls_ref[...]                          # (1, HC) class index per lane

        # ---- sufficiency: sum_b CE(y_pred_b, label_b); f32 epilogue ----------------------
        yp = y_pred_ref[...].astype(jnp.float32)           # cast in-kernel (native-dtype DMA)
        tgt_s = jnp.sum(jnp.where(col_cls[:, :C] == lab, yp, 0.0), axis=-1, keepdims=True)
        m_s = jnp.max(yp, axis=-1, keepdims=True)
        lse_s = jnp.log(jnp.sum(jnp.exp(yp - m_s), axis=-1, keepdims=True)) + m_s
        acc_suff[...] += jnp.sum((lse_s - tgt_s) * valid, axis=0, keepdims=True)

        # ---- minimality: one fused bf16 matmul for all H heads, slab-wide epilogue -------
        # logits[b, h*C + c] == head_h(z_cat_b)[c]; the label column of z_cat enters as a
        # rank-1 f32 term so z_cat never exists in HBM.
        logits = (jnp.dot(z_ref[...], w_z_ref[...], preferred_element_type=jnp.float32)
                  + lab * w_y_ref[...] + b_ref[...])       # (TB, HC) f32, kept as a value

        m = jnp.max(logits, axis=-1, keepdims=True)        # global per-row max is a valid
        p = jnp.exp(logits - m)                            # shift for every head's lse
        # per-head exp-sums via block-diagonal 0/1 selector on the MXU: (TB,HC)@(HC,H)
        s = jnp.dot(p, sel_ref[...], preferred_element_type=jnp.float32)       # (TB, H)
        log_s = jnp.sum(jnp.log(s), axis=-1, keepdims=True)                    # (TB, 1)
        # expand nuisance labels to HC lanes via (TB,H)@(H,HC), then one masked target sum
        nlab_exp = jnp.dot(nlab, expand_ref[...], preferred_element_type=jnp.float32)
        tgt_m = jnp.sum(jnp.where(col_cls == nlab_exp, logits, 0.0),
                        axis=-1, keepdims=True)                                 # (TB, 1)
        row_min = log_s + jnp.float32(H) * m - tgt_m       # sum_h (lse_h - tgt_h) per row
        acc_min[...] += jnp.sum(row_min * valid, axis=0, keepdims=True)

        # ---- finalize per core partial: dib_c = suff_c/B - beta * min_c/(B*H) ------------
        @pl.when(i == pl.num_programs(1) - 1)
        def _fin():
            dib = (acc_suff[...] / jnp.float32(Bt)
                   - jnp.float32(beta) * acc_min[...] / jnp.float32(Bt * H))
            out_ref[...] = jnp.broadcast_to(dib.reshape(1, 1, 1), out_ref.shape)

    return dib_kernel


# --------------------------------------------------------------------------------------
# wrapper
# --------------------------------------------------------------------------------------
def dib_loss(y_pred, z_sample, labels, x_idcs, nuisances, w_heads, b_heads, *, beta=1.0):
    """DIB loss forward value. Cheap XLA glue + a single batch-tiled Pallas hot path."""
    B, C = y_pred.shape
    H, Zp1, _ = w_heads.shape
    Zd = Zp1 - 1
    HC = H * C

    NC, TB, B_pad = _choose_tiling(B)
    steps = B_pad // (NC * TB)
    pad = B_pad - B

    # --- XLA glue: gathers, dtype casts, weight fusion, padding ---------------------------
    z = z_sample[0].astype(jnp.bfloat16)                               # (B, Zd) bf16 (MXU)
    nlab = jnp.transpose(nuisances[:, x_idcs]).astype(jnp.float32)     # (B, H) small ints
    lab_f = labels.astype(jnp.float32).reshape(B, 1)                   # (B, 1)
    valid = jnp.ones((B, 1), jnp.float32)
    labs = jnp.concatenate([lab_f, valid, nlab], axis=1)               # (B, H+2) merged block
    yp_in = y_pred                                                     # native dtype, no upcast
    if pad:
        z = jnp.pad(z, ((0, pad), (0, 0)))
        labs = jnp.pad(labs, ((0, pad), (0, 0)))                       # padded rows: valid == 0
        yp_in = jnp.pad(yp_in, ((0, pad), (0, 0)))

    # fused head weights: logits[:, h*C + c] == head_h(z_cat)[c]
    w_cat = jnp.transpose(w_heads, (1, 0, 2)).reshape(Zp1, HC)
    w_z = w_cat[:Zd, :].astype(jnp.bfloat16)                           # (Zd, HC) bf16
    w_y = w_cat[Zd:, :].astype(jnp.float32)                            # (1, HC)  f32 label row
    b_cat = b_heads.reshape(1, HC).astype(jnp.float32)                 # (1, HC)

    # tiny resident constants for the slab-wide epilogue
    col = jnp.arange(HC, dtype=jnp.int32)
    col_class = (col % C).astype(jnp.float32).reshape(1, HC)           # class index per lane
    sel = (col[:, None] // C
           == jnp.arange(H, dtype=jnp.int32)[None, :]).astype(jnp.float32)   # (HC, H)
    expand = jnp.transpose(sel)                                        # (H, HC)

    kernel = make_dib_kernel(H, C, B, float(beta))

    cost = pl.CostEstimate(
        flops=(2 * B_pad * Zd * HC + 2 * B_pad * HC * H + 2 * B_pad * H * HC
               + 8 * B_pad * HC + 8 * B_pad * C),
        transcendentals=B_pad * (HC + C + H + 1),
        bytes_accessed=(B_pad * C * y_pred.dtype.itemsize + B_pad * Zd * 2
                        + B_pad * (H + 2) * 4 + Zd * HC * 2
                        + (3 * HC + 2 * HC * H) * 4 + NC * 8 * 128 * 4))

    bspec_batch = lambda lastdim: pl.BlockSpec((TB, lastdim),
                                               lambda c, i: (c * steps + i, 0))
    bspec_res = lambda s0, s1: pl.BlockSpec((s0, s1), lambda c, i: (0, 0))

    out = pl.pallas_call(
        kernel,
        out_shape=jax.ShapeDtypeStruct((NC, 8, 128), jnp.float32),     # per-core partials
        grid_spec=pltpu.PrefetchScalarGridSpec(
            num_scalar_prefetch=0,
            grid=(NC, steps),
            in_specs=[
                bspec_batch(C),            # y_pred (native dtype)
                bspec_batch(H + 2),        # merged [label, valid, nuisance labels] (f32)
                bspec_batch(Zd),           # z (bf16)
                bspec_res(Zd, HC),         # fused head weights   (resident)
                bspec_res(1, HC),          # label-row weights    (resident)
                bspec_res(1, HC),          # fused biases         (resident)
                bspec_res(1, HC),          # per-lane class index (resident)
                bspec_res(HC, H),          # exp-sum selector     (resident)
                bspec_res(H, HC),          # nuisance expander    (resident)
            ],
            out_specs=pl.BlockSpec((1, 8, 128), lambda c, i: (c, 0, 0)),
            scratch_shapes=[
                pltpu.VMEM((1, 1), jnp.float32),   # per-core sufficiency CE sum
                pltpu.VMEM((1, 1), jnp.float32),   # per-core minimality CE sum
            ],
        ),
        compiler_params=pltpu.CompilerParams(
            # core axis 'parallel' (v7x 2-TC split; serial & harmless on 1-TC chips),
            # batch axis carries the accumulators => 'arbitrary'
            dimension_semantics=("parallel", "arbitrary"),
            vmem_limit_bytes=_vmem_budget_bytes(TB, C, Zd, H, HC, y_pred.dtype.itemsize)),
        cost_estimate=cost,
    )(yp_in, labs, z, w_z, w_y, b_cat, col_class, sel, expand)

    return jnp.sum(out[:, 0, 0])   # sum the per-core partials (linear in the CE sums)


# --------------------------------------------------------------------------------------
# pure-JAX reference (value-wise identical to the PyTorch forward)
# --------------------------------------------------------------------------------------
def dib_loss_ref(y_pred, z_sample, labels, x_idcs, nuisances, w_heads, b_heads, *,
                 beta=1.0, match_kernel_bf16=False):
    def ce(logits, tgt):
        lse = jax.scipy.special.logsumexp(logits, axis=-1)
        picked = jnp.take_along_axis(logits, tgt[:, None], axis=-1)[:, 0]
        return jnp.mean(lse - picked)

    h_suff = ce(y_pred.astype(jnp.float32), labels)

    z = z_sample[0].astype(jnp.float32)
    w_z = w_heads[:, :-1, :].astype(jnp.float32)
    w_y = w_heads[:, -1:, :].astype(jnp.float32)
    if match_kernel_bf16:
        z = z.astype(jnp.bfloat16).astype(jnp.float32)
        w_z = w_z.astype(jnp.bfloat16).astype(jnp.float32)
    lab_f = labels.astype(jnp.float32)[:, None]

    ces = []
    for h in range(w_heads.shape[0]):
        logits_h = z @ w_z[h] + lab_f @ w_y[h] + b_heads[h]
        ces.append(ce(logits_h, nuisances[h, x_idcs]))
    h_min = sum(ces) / len(ces)
    return h_suff - beta * h_min


if __name__ == "__main__":
    B, C, Zd, H, N_TRAIN, BETA = 8, 10, 32, 5, 64, 1.0

    key = jax.random.PRNGKey(0)
    k1, k2, k3, k4, k5, k6 = jax.random.split(key, 6)

    # module inputs:  out = (y_pred, z_sample), targets = (labels, x_idcs)
    y_pred = jax.random.normal(k1, (B, C), dtype=jnp.float32)
    z_sample = jax.random.normal(k2, (1, B, Zd), dtype=jnp.float32)   # (n_z_samples=1, B, z_dim)
    labels = jax.random.randint(k3, (B,), 0, C, dtype=jnp.int32)
    x_idcs = jax.random.randint(k4, (B,), 0, N_TRAIN, dtype=jnp.int32)

    # deterministic "parameters": NaiveNuisanceGetter buffer + linear V-heads
    nuisances = jax.random.randint(k5, (H, N_TRAIN), 0, C, dtype=jnp.int32)
    w_heads = 0.1 * jax.random.normal(k6, (H, Zd + 1, C), dtype=jnp.float32)
    b_heads = jnp.zeros((H, C), dtype=jnp.float32)

    dib = jax.block_until_ready(
        dib_loss(y_pred, z_sample, labels, x_idcs, nuisances, w_heads, b_heads, beta=BETA))

    ref_bf = dib_loss_ref(y_pred, z_sample, labels, x_idcs, nuisances, w_heads, b_heads,
                          beta=BETA, match_kernel_bf16=True)
    ref_f32 = dib_loss_ref(y_pred, z_sample, labels, x_idcs, nuisances, w_heads, b_heads,
                           beta=BETA, match_kernel_bf16=False)

    # tight check vs bf16-matched reference; loose check vs the exact-f32 module value
    assert abs(float(dib) - float(ref_bf)) < 2e-3, (float(dib), float(ref_bf))
    assert abs(float(dib) - float(ref_f32)) < 5e-2, (float(dib), float(ref_f32))

    print("KERNEL_OK")
</pallas_src>

<mosaic_0001>
module attributes {stable_mosaic.version = 11 : i64} {
  func.func @dib_kernel(%arg0: i32, %arg1: i32, %arg2: memref<8x10xf32, #tpu.memory_space<vmem>>, %arg3: memref<8x7xf32, #tpu.memory_space<vmem>>, %arg4: memref<8x32xbf16, #tpu.memory_space<vmem>>, %arg5: memref<32x50xbf16, #tpu.memory_space<vmem>>, %arg6: memref<1x50xf32, #tpu.memory_space<vmem>>, %arg7: memref<1x50xf32, #tpu.memory_space<vmem>>, %arg8: memref<1x50xf32, #tpu.memory_space<vmem>>, %arg9: memref<50x5xf32, #tpu.memory_space<vmem>>, %arg10: memref<5x50xf32, #tpu.memory_space<vmem>>, %arg11: memref<1x8x128xf32, #tpu.memory_space<vmem>>, %arg12: memref<1x1xf32, #tpu.memory_space<vmem>>, %arg13: memref<1x1xf32, #tpu.memory_space<vmem>>) attributes {dimension_semantics = [#tpu.dimension_semantics<parallel>, #tpu.dimension_semantics<arbitrary>], iteration_bounds = array<i64: 1, 1>, scalar_prefetch = 0 : i64, scratch_operands = 2 : i64, tpu.core_type = #tpu.core_type<tc>, window_params = [{transform_indices = @transform_0, window_bounds = array<i64: 8, 10>}, {transform_indices = @transform_1, window_bounds = array<i64: 8, 7>}, {transform_indices = @transform_2, window_bounds = array<i64: 8, 32>}, {pipeline_mode = #tpu.pipeline_mode<synchronous>, transform_indices = @transform_3, window_bounds = array<i64: 32, 50>}, {pipeline_mode = #tpu.pipeline_mode<synchronous>, transform_indices = @transform_4, window_bounds = array<i64: 1, 50>}, {pipeline_mode = #tpu.pipeline_mode<synchronous>, transform_indices = @transform_5, window_bounds = array<i64: 1, 50>}, {pipeline_mode = #tpu.pipeline_mode<synchronous>, transform_indices = @transform_6, window_bounds = array<i64: 1, 50>}, {pipeline_mode = #tpu.pipeline_mode<synchronous>, transform_indices = @transform_7, window_bounds = array<i64: 50, 5>}, {pipeline_mode = #tpu.pipeline_mode<synchronous>, transform_indices = @transform_8, window_bounds = array<i64: 5, 50>}, {transform_indices = @transform_9, window_bounds = array<i64: 1, 8, 128>}]} {
    %c0_i32 = arith.constant 0 : i32
    %0 = arith.cmpi eq, %arg1, %c0_i32 : i32
    %1 = arith.extui %0 : i1 to i32
    %c0_i32_0 = arith.constant 0 : i32
    %2 = arith.cmpi ne, %1, %c0_i32_0 : i32
    scf.if %2 {
      %cst_41 = arith.constant 0.000000e+00 : f32
      %75 = vector.broadcast %cst_41 : f32 to vector<1x1xf32>
      %c0_42 = arith.constant 0 : index
      %c0_43 = arith.constant 0 : index
      %76 = vector.load %arg12[%c0_42, %c0_43] : memref<1x1xf32, #tpu.memory_space<vmem>>, vector<1x1xf32>
      tpu.vector_store %arg12[%c0_42, %c0_43], %75 {strides = array<i32>} : memref<1x1xf32, #tpu.memory_space<vmem>>, vector<1x1xf32>,
      %cst_44 = arith.constant 0.000000e+00 : f32
      %77 = vector.broadcast %cst_44 : f32 to vector<1x1xf32>
      %c0_45 = arith.constant 0 : index
      %c0_46 = arith.constant 0 : index
      %78 = vector.load %arg13[%c0_45, %c0_46] : memref<1x1xf32, #tpu.memory_space<vmem>>, vector<1x1xf32>
      tpu.vector_store %arg13[%c0_45, %c0_46], %77 {strides = array<i32>} : memref<1x1xf32, #tpu.memory_space<vmem>>, vector<1x1xf32>,
    } else {
    }
    %c0 = arith.constant 0 : index
    %c0_1 = arith.constant 0 : index
    %3 = vector.load %arg3[%c0, %c0_1] : memref<8x7xf32, #tpu.memory_space<vmem>>, vector<8x7xf32>
    %4 = vector.extract_strided_slice %3 {offsets = [0, 0], sizes = [8, 1], strides = [1, 1]} : vector<8x7xf32> to vector<8x1xf32>
    %5 = vector.extract_strided_slice %3 {offsets = [0, 1], sizes = [8, 1], strides = [1, 1]} : vector<8x7xf32> to vector<8x1xf32>
    %6 = vector.extract_strided_slice %3 {offsets = [0, 2], sizes = [8, 5], strides = [1, 1]} : vector<8x7xf32> to vector<8x5xf32>
    %c0_2 = arith.constant 0 : index
    %c0_3 = arith.constant 0 : index
    %7 = vector.load %arg8[%c0_2, %c0_3] : memref<1x50xf32, #tpu.memory_space<vmem>>, vector<1x50xf32>
    %c0_4 = arith.constant 0 : index
    %c0_5 = arith.constant 0 : index
    %8 = vector.load %arg2[%c0_4, %c0_5] : memref<8x10xf32, #tpu.memory_space<vmem>>, vector<8x10xf32>
    %9 = vector.extract_strided_slice %7 {offsets = [0, 0], sizes = [1, 10], strides = [1, 1]} : vector<1x50xf32> to vector<1x10xf32>
    %10 = vector.broadcast %9 : vector<1x10xf32> to vector<8x10xf32>
    %11 = vector.broadcast %4 : vector<8x1xf32> to vector<8x10xf32>
    %12 = arith.cmpf oeq, %10, %11 : vector<8x10xf32>
    %cst = arith.constant 0.000000e+00 : f32
    %13 = vector.broadcast %cst : f32 to vector<8x10xf32>
    %14 = arith.select %12, %8, %13 : vector<8x10xi1>, vector<8x10xf32>
    %cst_6 = arith.constant dense<0.000000e+00> : vector<8xf32>
    %15 = vector.multi_reduction <add>, %14, %cst_6 [1] : vector<8x10xf32> to vector<8xf32>
    %16 = vector.shape_cast %15 : vector<8xf32> to vector<8x1xf32>
    %cst_7 = arith.constant dense<0xFF800000> : vector<8xf32>
    %17 = vector.multi_reduction <maximumf>, %8, %cst_7 [1] : vector<8x10xf32> to vector<8xf32>
    %18 = vector.shape_cast %17 : vector<8xf32> to vector<8x1xf32>
    %19 = vector.broadcast %18 : vector<8x1xf32> to vector<8x10xf32>
    %20 = arith.subf %8, %19 : vector<8x10xf32>
    %21 = math.exp %20 : vector<8x10xf32>
    %cst_8 = arith.constant dense<0.000000e+00> : vector<8xf32>
    %22 = vector.multi_reduction <add>, %21, %cst_8 [1] : vector<8x10xf32> to vector<8xf32>
    %23 = vector.shape_cast %22 : vector<8xf32> to vector<8x1xf32>
    %24 = math.log %23 : vector<8x1xf32>
    %25 = arith.addf %24, %18 : vector<8x1xf32>
    %c0_9 = arith.constant 0 : index
    %c0_10 = arith.constant 0 : index
    %26 = vector.load %arg12[%c0_9, %c0_10] : memref<1x1xf32, #tpu.memory_space<vmem>>, vector<1x1xf32>
    %27 = arith.subf %25, %16 : vector<8x1xf32>
    %28 = arith.mulf %27, %5 : vector<8x1xf32>
    %cst_11 = arith.constant dense<0.000000e+00> : vector<1xf32>
    %29 = vector.multi_reduction <add>, %28, %cst_11 [0] : vector<8x1xf32> to vector<1xf32>
    %30 = vector.shape_cast %29 : vector<1xf32> to vector<1x1xf32>
    %31 = arith.addf %26, %30 : vector<1x1xf32>
    %c0_12 = arith.constant 0 : index
    %c0_13 = arith.constant 0 : index
    %32 = vector.load %arg12[%c0_12, %c0_13] : memref<1x1xf32, #tpu.memory_space<vmem>>, vector<1x1xf32>
    tpu.vector_store %arg12[%c0_12, %c0_13], %31 {strides = array<i32>} : memref<1x1xf32, #tpu.memory_space<vmem>>, vector<1x1xf32>,
    %c0_14 = arith.constant 0 : index
    %c0_15 = arith.constant 0 : index
    %33 = vector.load %arg4[%c0_14, %c0_15] : memref<8x32xbf16, #tpu.memory_space<vmem>>, vector<8x32xbf16>
    %c0_16 = arith.constant 0 : index
    %c0_17 = arith.constant 0 : index
    %34 = vector.load %arg5[%c0_16, %c0_17] : memref<32x50xbf16, #tpu.memory_space<vmem>>, vector<32x50xbf16>
    %cst_18 = arith.constant dense<0.000000e+00> : vector<8x50xf32>
    %35 = tpu.matmul %33, %34, %cst_18 {dimension_numbers = #tpu.dot_dimension_numbers<[1], [0], [0], [1], [0, 0, 1, 1], [], []>} : vector<8x32xbf16>, vector<32x50xbf16>, vector<8x50xf32> -> vector<8x50xf32>
    %c0_19 = arith.constant 0 : index
    %c0_20 = arith.constant 0 : index
    %36 = vector.load %arg6[%c0_19, %c0_20] : memref<1x50xf32, #tpu.memory_space<vmem>>, vector<1x50xf32>
    %37 = vector.broadcast %4 : vector<8x1xf32> to vector<8x50xf32>
    %38 = vector.broadcast %36 : vector<1x50xf32> to vector<8x50xf32>
    %39 = arith.mulf %37, %38 : vector<8x50xf32>
    %40 = arith.addf %35, %39 : vector<8x50xf32>
    %c0_21 = arith.constant 0 : index
    %c0_22 = arith.constant 0 : index
    %41 = vector.load %arg7[%c0_21, %c0_22] : memref<1x50xf32, #tpu.memory_space<vmem>>, vector<1x50xf32>
    %42 = vector.broadcast %41 : vector<1x50xf32> to vector<8x50xf32>
    %43 = arith.addf %40, %42 : vector<8x50xf32>
    %cst_23 = arith.constant dense<0xFF800000> : vector<8xf32>
    %44 = vector.multi_reduction <maximumf>, %43, %cst_23 [1] : vector<8x50xf32> to vector<8xf32>
    %45 = vector.shape_cast %44 : vector<8xf32> to vector<8x1xf32>
    %46 = vector.broadcast %45 : vector<8x1xf32> to vector<8x50xf32>
    %47 = arith.subf %43, %46 : vector<8x50xf32>
    %48 = math.exp %47 : vector<8x50xf32>
    %c0_24 = arith.constant 0 : index
    %c0_25 = arith.constant 0 : index
    %49 = vector.load %arg9[%c0_24, %c0_25] : memref<50x5xf32, #tpu.memory_space<vmem>>, vector<50x5xf32>
    %cst_26 = arith.constant dense<0.000000e+00> : vector<8x5xf32>
    %50 = tpu.matmul %48, %49, %cst_26 {dimension_numbers = #tpu.dot_dimension_numbers<[1], [0], [0], [1], [0, 0, 1, 1], [], []>} : vector<8x50xf32>, vector<50x5xf32>, vector<8x5xf32> -> vector<8x5xf32>
    %51 = math.log %50 : vector<8x5xf32>
    %cst_27 = arith.constant dense<0.000000e+00> : vector<8xf32>
    %52 = vector.multi_reduction <add>, %51, %cst_27 [1] : vector<8x5xf32> to vector<8xf32>
    %53 = vector.shape_cast %52 : vector<8xf32> to vector<8x1xf32>
    %c0_28 = arith.constant 0 : index
    %c0_29 = arith.constant 0 : index
    %54 = vector.load %arg10[%c0_28, %c0_29] : memref<5x50xf32, #tpu.memory_space<vmem>>, vector<5x50xf32>
    %cst_30 = arith.constant dense<0.000000e+00> : vector<8x50xf32>
    %55 = tpu.matmul %6, %54, %cst_30 {dimension_numbers = #tpu.dot_dimension_numbers<[1], [0], [0], [1], [0, 0, 1, 1], [], []>} : vector<8x5xf32>, vector<5x50xf32>, vector<8x50xf32> -> vector<8x50xf32>
    %56 = vector.broadcast %7 : vector<1x50xf32> to vector<8x50xf32>
    %57 = arith.cmpf oeq, %56, %55 : vector<8x50xf32>
    %cst_31 = arith.constant 0.000000e+00 : f32
    %58 = vector.broadcast %cst_31 : f32 to vector<8x50xf32>
    %59 = arith.select %57, %43, %58 : vector<8x50xi1>, vector<8x50xf32>
    %cst_32 = arith.constant dense<0.000000e+00> : vector<8xf32>
    %60 = vector.multi_reduction <add>, %59, %cst_32 [1] : vector<8x50xf32> to vector<8xf32>
    %61 = vector.shape_cast %60 : vector<8xf32> to vector<8x1xf32>
    %cst_33 = arith.constant 5.000000e+00 : f32
    %62 = vector.broadcast %cst_33 : f32 to vector<8x1xf32>
    %63 = arith.mulf %62, %45 : vector<8x1xf32>
    %64 = arith.addf %53, %63 : vector<8x1xf32>
    %65 = arith.subf %64, %61 : vector<8x1xf32>
    %c0_34 = arith.constant 0 : index
    %c0_35 = arith.constant 0 : index
    %66 = vector.load %arg13[%c0_34, %c0_35] : memref<1x1xf32, #tpu.memory_space<vmem>>, vector<1x1xf32>
    %67 = arith.mulf %65, %5 : vector<8x1xf32>
    %cst_36 = arith.constant dense<0.000000e+00> : vector<1xf32>
    %68 = vector.multi_reduction <add>, %67, %cst_36 [0] : vector<8x1xf32> to vector<1xf32>
    %69 = vector.shape_cast %68 : vector<1xf32> to vector<1x1xf32>
    %70 = arith.addf %66, %69 : vector<1x1xf32>
    %c0_37 = arith.constant 0 : index
    %c0_38 = arith.constant 0 : index
    %71 = vector.load %arg13[%c0_37, %c0_38] : memref<1x1xf32, #tpu.memory_space<vmem>>, vector<1x1xf32>
    tpu.vector_store %arg13[%c0_37, %c0_38], %70 {strides = array<i32>} : memref<1x1xf32, #tpu.memory_space<vmem>>, vector<1x1xf32>,
    %c0_i32_39 = arith.constant 0 : i32
    %72 = arith.cmpi eq, %arg1, %c0_i32_39 : i32
    %73 = arith.extui %72 : i1 to i32
    %c0_i32_40 = arith.constant 0 : i32
    %74 = arith.cmpi ne, %73, %c0_i32_40 : i32
    scf.if %74 {
      %c0_41 = arith.constant 0 : index
      %c0_42 = arith.constant 0 : index
      %75 = vector.load %arg12[%c0_41, %c0_42] : memref<1x1xf32, #tpu.memory_space<vmem>>, vector<1x1xf32>
      %cst_43 = arith.constant 8.000000e+00 : f32
      %76 = vector.broadcast %cst_43 : f32 to vector<1x1xf32>
      %77 = arith.divf %75, %76 : vector<1x1xf32>
      %c0_44 = arith.constant 0 : index
      %c0_45 = arith.constant 0 : index
      %78 = vector.load %arg13[%c0_44, %c0_45] : memref<1x1xf32, #tpu.memory_space<vmem>>, vector<1x1xf32>
      %cst_46 = arith.constant 1.000000e+00 : f32
      %79 = vector.broadcast %cst_46 : f32 to vector<1x1xf32>
      %80 = arith.mulf %79, %78 : vector<1x1xf32>
      %cst_47 = arith.constant 4.000000e+01 : f32
      %81 = vector.broadcast %cst_47 : f32 to vector<1x1xf32>
      %82 = arith.divf %80, %81 : vector<1x1xf32>
      %83 = arith.subf %77, %82 : vector<1x1xf32>
      %84 = vector.shape_cast %83 : vector<1x1xf32> to vector<1x1x1xf32>
      %85 = vector.shape_cast %84 : vector<1x1x1xf32> to vector<1x1x1xf32>
      %86 = vector.broadcast %85 : vector<1x1x1xf32> to vector<1x8x128xf32>
      %c0_48 = arith.constant 0 : index
      %c0_49 = arith.constant 0 : index
      %c0_50 = arith.constant 0 : index
      %87 = vector.load %arg11[%c0_48, %c0_49, %c0_50] : memref<1x8x128xf32, #tpu.memory_space<vmem>>, vector<1x8x128xf32>
      tpu.vector_store %arg11[%c0_48, %c0_49, %c0_50], %86 {strides = array<i32>} : memref<1x8x128xf32, #tpu.memory_space<vmem>>, vector<1x8x128xf32>,
    } else {
    }
    return
  }
  func.func @transform_0(%arg0: i32, %arg1: i32) -> (i32, i32) {
    %c1_i32 = arith.constant 1 : i32
    %0 = arith.muli %arg0, %c1_i32 : i32
    %1 = arith.addi %0, %arg1 : i32
    %c0_i32 = arith.constant 0 : i32
    %c0_i32_0 = arith.constant 0 : i32
    return %1, %c0_i32 : i32, i32
  }
  func.func @transform_1(%arg0: i32, %arg1: i32) -> (i32, i32) {
    %c1_i32 = arith.constant 1 : i32
    %0 = arith.muli %arg0, %c1_i32 : i32
    %1 = arith.addi %0, %arg1 : i32
    %c0_i32 = arith.constant 0 : i32
    %c0_i32_0 = arith.constant 0 : i32
    return %1, %c0_i32 : i32, i32
  }
  func.func @transform_2(%arg0: i32, %arg1: i32) -> (i32, i32) {
    %c1_i32 = arith.constant 1 : i32
    %0 = arith.muli %arg0, %c1_i32 : i32
    %1 = arith.addi %0, %arg1 : i32
    %c0_i32 = arith.constant 0 : i32
    %c0_i32_0 = arith.constant 0 : i32
    return %1, %c0_i32 : i32, i32
  }
  func.func @transform_3(%arg0: i32, %arg1: i32) -> (i32, i32) {
    %c0_i32 = arith.constant 0 : i32
    %c0_i32_0 = arith.constant 0 : i32
    %c0_i32_1 = arith.constant 0 : i32
    return %c0_i32, %c0_i32_0 : i32, i32
  }
  func.func @transform_4(%arg0: i32, %arg1: i32) -> (i32, i32) {
    %c0_i32 = arith.constant 0 : i32
    %c0_i32_0 = arith.constant 0 : i32
    %c0_i32_1 = arith.constant 0 : i32
    return %c0_i32, %c0_i32_0 : i32, i32
  }
  func.func @transform_5(%arg0: i32, %arg1: i32) -> (i32, i32) {
    %c0_i32 = arith.constant 0 : i32
    %c0_i32_0 = arith.constant 0 : i32
    %c0_i32_1 = arith.constant 0 : i32
    return %c0_i32, %c0_i32_0 : i32, i32
  }
  func.func @transform_6(%arg0: i32, %arg1: i32) -> (i32, i32) {
    %c0_i32 = arith.constant 0 : i32
    %c0_i32_0 = arith.constant 0 : i32
    %c0_i32_1 = arith.constant 0 : i32
    return %c0_i32, %c0_i32_0 : i32, i32
  }
  func.func @transform_7(%arg0: i32, %arg1: i32) -> (i32, i32) {
    %c0_i32 = arith.constant 0 : i32
    %c0_i32_0 = arith.constant 0 : i32
    %c0_i32_1 = arith.constant 0 : i32
    return %c0_i32, %c0_i32_0 : i32, i32
  }
  func.func @transform_8(%arg0: i32, %arg1: i32) -> (i32, i32) {
    %c0_i32 = arith.constant 0 : i32
    %c0_i32_0 = arith.constant 0 : i32
    %c0_i32_1 = arith.constant 0 : i32
    return %c0_i32, %c0_i32_0 : i32, i32
  }
  func.func @transform_9(%arg0: i32, %arg1: i32) -> (i32, i32, i32) {
    %c0_i32 = arith.constant 0 : i32
    %c0_i32_0 = arith.constant 0 : i32
    %c0_i32_1 = arith.constant 0 : i32
    return %arg0, %c0_i32, %c0_i32_0 : i32, i32, i32
  }
}

</mosaic_0001>

<bundles_post_ra>
// kernel: tpu_custom_call.1
= control target key start
LH: loop header
LB: loop body
LE: loop exit
PB: predicated region body
PF: predicated region fallthrough
CT: control target
= control target key end

     0   :  { %s592_s13 = smov 126   ;;  %v593_v2 = vmov 0.0   ;;  %vm594_vm0 = vmmov 0   ;;  %v595_v4 = vmov 0   ;;  %s749_s0 = inlined_call_operand.vmem [shape: f32[8,10], index: 0, kind: input, shape index: {}]   ;;  %s750_s1 = inlined_call_operand.vmem [shape: f32[8,7], index: 1, kind: input, shape index: {}]   ;;  %s751_s2 = inlined_call_operand.vmem [shape: bf16[8,32], index: 2, kind: input, shape index: {}]   ;;  %s752_s3 = inlined_call_operand.vmem [shape: bf16[32,50], index: 3, kind: input, shape index: {}]   ;;  %s753_s4 = inlined_call_operand.vmem [shape: f32[1,50], index: 4, kind: input, shape index: {}]   ;;  %s754_s5 = inlined_call_operand.vmem [shape: f32[1,50], index: 5, kind: input, shape index: {}]   ;;  %s755_s6 = inlined_call_operand.vmem [shape: f32[1,50], index: 6, kind: input, shape index: {}]   ;;  %s756_s7 = inlined_call_operand.vmem [shape: f32[50,5], index: 7, kind: input, shape index: {}]   ;;  %s757_s8 = inlined_call_operand.vmem [shape: f32[5,50], index: 8, kind: input, shape index: {}]   ;;  %s758_s9 = inlined_call_operand.hbm [shape: f32[1,8,128], index: 9, kind: output, shape index: {}]  }
   0x1   :  { %v652_v0 = vld [vmem:[%s750_s1] sm:$0xff]  ;;  %v560_v1 = vld [vmem:[%s752_s3 + $0x8] sm:$0xff]   ;;  %521 = vmatprep.subr.bf16.mxu0 %v593_v2  ;;  %529 = vmatprep.subr.mxu1 %v593_v2 }
   0x2   :  { %331 = vrot.lane.b32.xlu1 %v652_v0, %s592_s13  ;;  %522 = vmatpush3.bf16.msra.mxu0 %v560_v1  ;;  %v561_v3 = vld [vmem:[%s752_s3] sm:$0xff]  }
   0x3   :  { %523 = vmatprep.subr.bf16.mxu0 %v593_v2  ;;  %525 = vmatprep.mubr.msk.bf16.mxu0 %vm594_vm0, %v593_v2 }
   0x4   :  { %558 = vset.pattern.permute.xlu0 %v595_v4  ;;  %543 = vmatprep.mubr.msk.f32.mxu1 %vm594_vm0, %v593_v2 }
   0x5   :  { %14 = vsyncpa [#allocation5], 0  ;;  %103 = vperm.xlu0 %558, %v652_v0   ;;  %559 = vset.pattern.permute.xlu1 %v595_v4  ;;  %v156_v5 = vld [vmem:[%s751_s2] sm:$0xf]  ;;  %vm181_vm1 = vcmask 261120   ;;  %vm335_vm2 = vcmask 1044480   ;;  %v139_v53 = vlaneseq }
   0x6   :  { %524 = vmatpush3.bf16.msra.mxu0 %v561_v3  ;;  %v330_v6 = vld [vmem:[%s757_s8] sm:$0x1f]  ;;  %vm108_vm3 = vcmask 80896   ;;  %vm326_vm4 = vcmask 39936   ;;  %vm233_vm6 = vcmask 408576   ;;  %vm250_vm7 = vcmask 1041408  }
   0x7   :  { %546 = vmatprep.subr.mxu0 %v593_v2  ;;  %v94_v7 = vld [vmem:[%s749_s0] sm:$0xff]  ;;  %v246_v29 = vld [vmem:[%s756_s7 + $0x30] sm:$0x3]  ;;  %v245_v30 = vld [vmem:[%s756_s7 + $0x28] sm:$0xff]  ;;  %vm89_vm8 = vcmask 0   ;;  %vm127_vm9 = vcmask 15368  }
   0x8   :  { %v112_v8 = vsel %vm108_vm3, %v94_v7, -inf  ;;  %v686_v10 = vld [vmem:[%s755_s6] ss:$0 sm:$0xff]  ;;  %530 = vmatpush3.msk.msra.mxu1 %vm250_vm7, %v246_v29  ;;  %v243_v32 = vld [vmem:[%s756_s7 + $0x18] sm:$0xff]  ;;  %v242_v33 = vld [vmem:[%s756_s7 + $0x10] sm:$0xff]  ;;  %v140_v57 = vshrl.u32 %v139_v53, 7 }
   0x9   :  { %526 = vmatmul.mubr.msk.bf16.vlgmr.msra.gmra.mxu0 %vm181_vm1, %v156_v5  ;;  %v499_v17 = vld [vmem:[%s753_s4] ss:$0 sm:$0xff]  ;;  %531 = vmatprep.subr.mxu1 %v593_v2  ;;  %v241_v34 = vld [vmem:[%s756_s7 + $0x8] sm:$0xff]  ;;  %90 = vst.msk [vmem:[#allocation2] sm:$0x1] %vm89_vm8, %v593_v2  ;;  %s598_s13 = smov [#allocation4]  }
   0xa   :  { %547 = vmatpush3.msk.msra.mxu0 %vm335_vm2, %v330_v6  ;;  %548 = vmatprep.mubr.msk.f32.mxu0 %vm594_vm0, %v593_v2  ;;  %v503_v20 = vld [vmem:[%s754_s5] ss:$0 sm:$0xff]  ;;  %91 = vst.msk [vmem:[#allocation3] sm:$0x1] %vm89_vm8, %v593_v2  ;;  %v596_v51 = vmov 1966171168  }
   0xb   :  { %532 = vmatpush3.msra.mxu1 %v245_v30  ;;  %v244_v31 = vld [vmem:[%s756_s7 + $0x20] sm:$0xff]  ;;  %v137_v52 = vunpack.c.l.s4 %v596_v51  ;;  %s472_s14 = sshll.u32 %s598_s13, 4  ;;  %s473_s14 = int_to_ptr.vmem [resolvable:$true] %s472_s14 }
   0xc   :  { %533 = vmatprep.subr.mxu1 %v593_v2  ;;  %v240_v35 = vld [vmem:[%s756_s7] sm:$0xff]  ;;  %s597_s7 = smov 127   ;;  %s570_s15 = scalar_lea.vmem %s473_s14, 128 }
   0xd   :  { %534 = vmatpush3.msra.mxu1 %v244_v31  ;;  %v138_v56 = vunpack.c.0.s8 %v137_v52  ;;  %p571_p0 = scmp.ne.s32.totalorder %s473_s14, %s570_s15  ;;  %p575_p1 = scmp.lt.s32.totalorder %s473_s14, %s473_s14 }
   0xe   :  { %535 = vmatprep.subr.mxu1 %v593_v2  ;;  %p576_p2 = scmp.lt.s32.totalorder %s570_s15, %s570_s15 }
   0xf   :  { %536 = vmatpush3.msra.mxu1 %v243_v32  ;;  %v141_v60 = vsub.s32 %v138_v56, %v140_v57  ;;  %v459_v32 = vsub.s32 0, %v140_v57 }
  0x10   :  { %537 = vmatprep.subr.mxu1 %v593_v2  ;;  %v124_v1 = vld [vmem:[#allocation2] sm:$0x1]  ;;  %p577_p3 = por %p576_p2, %p575_p1 }
  0x11   :  { %538 = vmatpush3.msra.mxu1 %v242_v33 }
  0x12   :  { %539 = vmatprep.subr.mxu1 %v593_v2  ;;  %p578_p4 = pnand %p577_p3, %p571_p0 }
  0x13   :  { %540 = vmatpush3.msra.mxu1 %v241_v34 }
  0x14   :  { %541 = vmatprep.subr.mxu1 %v593_v2 }
  0x15   :  { %542 = vmatpush3.msra.mxu1 %v240_v35 }
  0x26   :  { %113 = vmax.xlane.f32.xlu1 %v112_v8 }
  0x74   :  { %v332_v9 = vpop.permute.xlu1 %331 }
  0x75   :  { %549 = vmatmul.mubr.msk.f32.vlgmr.msra.gmra.mxu0 %vm326_vm4, %v332_v9 }
  0x80   :  { %v104_v11 = vpop.permute.xlu0 %103 }
  0x81   :  { %vm106_vm5 = vcmp.eq.f32.partialorder %v686_v10, %v104_v11  ;;  %v168_v18 = vmul.f32 %v499_v17, %v104_v11 }
  0x82   :  { %v107_v12 = vsel %vm106_vm5, %v94_v7, 0.0 }
  0x83   :  { %v109_v13 = vsel %vm108_vm3, %v107_v12, 0.0 }
  0x84   :  { %110 = vadd.xlane.f32.xlu1 %v109_v13 }
  0xaf   :  { %v114_v14 = vpop.xlane.xlu1 %113 }
  0xb0   :  { %v115_v15 = vsub.f32 %v94_v7, %v114_v14 }
  0xb2   :  { %v116_v16 = vmul.f32 1.442695, %v115_v15 }
  0xb4   :  { %562 = vpow2.f32 %v116_v16 }
  0xc1   :  { %v563_v24 = vpop.eup %562 }
  0xc2   :  { %v118_v28 = vsel %vm108_vm3, %v563_v24, 0.0 }
  0xc9   :  { %v219_v19 = vpop.f32.mrf.mxu0 }
  0xca   :  { %v220_v21 = vadd.f32 %v219_v19, %v168_v18 }
  0xcb   :  { %v527_v22 = vpop.f32.mrf.mxu0 }
  0xcc   :  { %v696_v23 = vadd.f32 %v503_v20, %v220_v21 }
  0xcd   :  { %v222_v25 = vpop.f32.mrf.mxu0 }
  0xce   :  { %v234_v26 = vsel %vm233_vm6, %v696_v23, -inf }
  0xcf   :  { %235 = vmax.xlane.f32.xlu0 %v234_v26  ;;  %v528_v27 = vpop.f32.mrf.mxu0  ;;  %v417_v26 = vld [vmem:[#allocation3] sm:$0x1] }
  0xd3   :  { %119 = vadd.xlane.f32.xlu0 %v118_v28 }
 0x10d   :  { %v111_v46 = vpop.xlane.xlu1 %110 }
 0x135   :  { %v405_v36 = vpop.f32.mrf.mxu0 }
 0x136   :  { %vm409_vm10 = vcmp.eq.f32.partialorder %v686_v10, %v405_v36 }
 0x137   :  { %v550_v37 = vpop.f32.mrf.mxu0  ;;  %v410_v9 = vsel %vm409_vm10, %v696_v23, 0.0 }
 0x138   :  { %v411_v11 = vsel %vm233_vm6, %v410_v9, 0.0 }
 0x158   :  { %v236_v38 = vpop.xlane.xlu0 %235 }
 0x159   :  { %v237_v39 = vsub.f32 %v696_v23, %v236_v38  ;;  %v414_v13 = vmul.f32 5.0, %v236_v38 }
 0x15b   :  { %v238_v40 = vmul.f32 1.442695, %v237_v39 }
 0x15c   :  { %v120_v41 = vpop.xlane.xlu0 %119 }
 0x15d   :  { %564 = vpow2.f32 %v238_v40 }
 0x15e   :  { %566 = vlog2.f32 %v120_v41 }
 0x16a   :  { %v565_v42 = vpop.eup %564 }
 0x16b   :  { %v567_v43 = vpop.eup %566  ;;  %544 = vmatmul.mubr.msk.f32.vlgmr.msra.gmra.mxu1 %vm233_vm6, %v565_v42 }
 0x16c   :  { %v122_v44 = vmul.f32 0.6931472, %v567_v43 }
 0x16e   :  { %v123_v45 = vadd.f32 %v122_v44, %v114_v14 }
 0x170   :  { %v125_v47 = vsub.f32 %v123_v45, %v111_v46 }
 0x172   :  { %v126_v48 = vmul.f32 %v125_v47, %v652_v0 }
 0x174   :  { %v128_v49 = vsel %vm127_vm9, %v126_v48, 0.0 }
 0x175   :  { %v129_v50 = vrot.slane %v128_v49, 4 }
 0x177   :  { %v130_v54 = vadd.f32 %v129_v50, %v128_v49 }
 0x179   :  { %v131_v55 = vrot.slane %v130_v54, 2 }
 0x17b   :  { %v132_v58 = vadd.f32 %v131_v55, %v130_v54 }
 0x17d   :  { %v133_v59 = vrot.slane %v132_v58, 1 }
 0x17f   :  { %v134_v61 = vadd.f32 %v133_v59, %v132_v58 }
 0x181   :  { %v142_v62 = vrot.slane %v134_v61, %v141_v60 }
 0x183   :  { %v149_v63 = vrot.slane %v142_v62, %v141_v60 }
 0x185   :  { %150 = vrot.lane.b32.xlu1 %v149_v63, %s597_s7 }
 0x1f7   :  { %v151_v2 = vpop.permute.xlu1 %150 }
 0x1f8   :  { %v153_v3 = vadd.f32 %v151_v2, %v124_v1 }
 0x1fa   :  { %155 = vst.msk [vmem:[#allocation2] sm:$0x1] %vm89_vm8, %v153_v3 }
 0x201   :  { %v449_v29 = vld [vmem:[#allocation2] sm:$0x1] }
 0x22b   :  { %v320_v4 = vpop.f32.mrf.mxu1 }
 0x22c   :  { %568 = vlog2.f32 %v320_v4 }
 0x22d   :  { %v545_v5 = vpop.f32.mrf.mxu1 }
 0x239   :  { %v569_v6 = vpop.eup %568 }
 0x23a   :  { %v325_v7 = vmul.f32 0.6931472, %v569_v6 }
 0x23c   :  { %v327_v8 = vsel %vm326_vm4, %v325_v7, 0.0 }
 0x23d   :  { %328 = vadd.xlane.f32.xlu0 %v327_v8 }
 0x241   :  { %412 = vadd.xlane.f32.xlu0 %v411_v11 }
 0x2c6   :  { %v329_v12 = vpop.xlane.xlu0 %328 }
 0x2c7   :  { %v415_v14 = vadd.f32 %v414_v13, %v329_v12 }
 0x2ca   :  { %v413_v15 = vpop.xlane.xlu0 %412 }
 0x2cb   :  { %v416_v16 = vsub.f32 %v415_v14, %v413_v15 }
 0x2cd   :  { %v418_v17 = vmul.f32 %v416_v16, %v652_v0  ;;  %v451_v0 = vmul.f32 0.125, %v449_v29 }
 0x2cf   :  { %v419_v18 = vsel %vm127_vm9, %v418_v17, 0.0 }
 0x2d0   :  { %v420_v19 = vrot.slane %v419_v18, 4 }
 0x2d2   :  { %v421_v10 = vadd.f32 %v420_v19, %v419_v18 }
 0x2d4   :  { %v422_v20 = vrot.slane %v421_v10, 2 }
 0x2d6   :  { %v423_v21 = vadd.f32 %v422_v20, %v421_v10 }
 0x2d8   :  { %v424_v22 = vrot.slane %v423_v21, 1 }
 0x2da   :  { %v425_v24 = vadd.f32 %v424_v22, %v423_v21 }
 0x2dc   :  { %v433_v25 = vrot.slane %v425_v24, %v141_v60 }
 0x2de   :  { %v440_v23 = vrot.slane %v433_v25, %v141_v60 }
 0x2e0   :  { %441 = vrot.lane.b32.xlu0 %v440_v23, %s597_s7 }
 0x352   :  { %v442_v27 = vpop.permute.xlu0 %441 }
 0x353   :  { %v444_v28 = vadd.f32 %v442_v27, %v417_v26 }
 0x355   :  { %445 = vst.msk [vmem:[#allocation3] sm:$0x1] %vm89_vm8, %v444_v28 }
 0x35c   :  { %v452_v30 = vld [vmem:[#allocation3] sm:$0x1] }
 0x35d   :  { %v454_v31 = vmul.f32 0.025, %v452_v30 }
 0x35f   :  { %v455_v33 = vsub.f32 %v451_v0, %v454_v31 }
 0x361   :  { %v460_v34 = vrot.slane %v455_v33, %v459_v32 }
 0x363   :  { %462 = vperm.xlu1 %559, %v460_v34  }
 0x3de   :  { %v463_v35 = vpop.permute.xlu1 %462 }
 0x3df   :  { %465 = vst [vmem:[#allocation4] sm:$0xff] %v463_v35 }
 0x3e0   :  { %581 = shalt.err (!%p578_p4)
}
 0x3e1   :  { %475 = dma.vmem_to_hbm [thread:$0]  %s473_s14, 128, %s758_s9, [#allocation5]  }
 0x3e2   :  { %590 = dma.done.wait [#allocation5], 128  }
 0x3e3   :  { %591 = vsyncadd [#allocation5], 4294967168 }
 0x3e4   :  { %479 = vsyncpa [#allocation5], 1 }

</bundles_post_ra>
